<compile_context>
chip_gen: v7x
topology: tpu7x:2x2x1
jax: 0.10.0
libtpu: 0.0.40
codegen_flags: <defaults>
</compile_context>

<pallas_src>
import numpy as np
import jax
import jax.numpy as jnp
from jax.experimental import pallas as pl
from jax.experimental.pallas import tpu as pltpu


_LANES = 128
_SMALL_INPUT_BYTES = 1 << 20          # below this, plain XLA beats a pallas_call


def _build_pe(d_model: int, max_len: int = 100) -> jnp.ndarray:
    """Deterministic sinusoidal positional-encoding table, matches torch init."""
    position = np.arange(0, max_len, dtype=np.float32)[:, None]             # (max_len, 1)
    div_term = np.exp(np.arange(0, d_model, 2, dtype=np.float32)
                      * (-np.log(10000.0) / d_model))                       # (ceil(d/2),)
    pe = np.zeros((max_len, d_model), dtype=np.float32)
    pe[:, 0::2] = np.sin(position * div_term)
    pe[:, 1::2] = np.cos(position * div_term[: d_model // 2])
    return jnp.asarray(pe)[None, :, :]                                      # (1, max_len, d_model)


def _generation_params():
    """(target_tile_bytes, vmem_limit_bytes) per TPU generation."""
    kind = ""
    try:
        kind = jax.devices()[0].device_kind.lower()
    except Exception:
        pass
    if ("v5 lite" in kind) or ("v5e" in kind) or ("v5lite" in kind):
        # v5e: scoped-VMEM default is only 16 MiB; ~2 MiB tiles already hide
        # the per-step overhead at ~0.8 TB/s HBM.
        return 2 * 1024 * 1024, 32 * 1024 * 1024
    if "v6" in kind:
        # v6e: 128 MiB VMEM -> big tiles, fewer 0.35 us step overheads.
        return 8 * 1024 * 1024, 64 * 1024 * 1024
    if ("v7" in kind) or ("tpu7" in kind):
        # v7x: only 64 MiB VMEM per TC -> cap tiles at ~4 MiB, steady-state
        # double-buffered footprint stays ~24 MiB.
        return 4 * 1024 * 1024, 40 * 1024 * 1024
    return 2 * 1024 * 1024, 32 * 1024 * 1024       # conservative default


def _sublane_multiple(itemsize: int) -> int:
    """Rows per sublane pack: 8 for f32, 16 for bf16, 32 for int8/fp8."""
    return max(8, 32 // max(1, itemsize))


def _row_tile(num_rows: int, row_bytes: int, sublane: int, target_bytes: int) -> int:
    """Row-tile size: full extent if it fits the target, else a sublane multiple."""
    if num_rows <= sublane:
        return num_rows
    tr = min(num_rows, max(1, target_bytes // max(1, row_bytes)))
    if tr >= num_rows:
        return num_rows
    return max(sublane, (tr // sublane) * sublane)


def _batch_tile(batch: int, slab_bytes: int, target_bytes: int) -> int:
    """How many batch rows to fold into one block to reach ~target_bytes."""
    return int(min(batch, max(1, target_bytes // max(1, slab_bytes))))


def _add_pe_kernel(x_ref, pe_ref, o_ref):
    # x block: (tb, rt, C); pe block: (1, rt, C) -> broadcast over tb.
    o_ref[...] = (x_ref[...] + pe_ref[...]).astype(o_ref.dtype)


def _tiled_add(x3: jnp.ndarray, pe3: jnp.ndarray, row_tile: int,
               batch_tile: int, vmem_limit: int) -> jnp.ndarray:
    """x3: (B, R, C); pe3: (1, R, C).  Grid = (row-tiles, batch-tiles), batch inner."""
    B, R, C = x3.shape
    nt = pl.cdiv(R, row_tile)
    nb = pl.cdiv(B, batch_tile)
    return pl.pallas_call(
        _add_pe_kernel,
        out_shape=jax.ShapeDtypeStruct((B, R, C), x3.dtype),
        grid_spec=pltpu.PrefetchScalarGridSpec(
            num_scalar_prefetch=0,
            grid=(nt, nb),
            in_specs=[
                pl.BlockSpec((batch_tile, row_tile, C), lambda t, b: (b, t, 0)),  # x
                pl.BlockSpec((1, row_tile, C), lambda t, b: (0, t, 0)),           # pe (b-invariant)
            ],
            out_specs=pl.BlockSpec((batch_tile, row_tile, C), lambda t, b: (b, t, 0)),
        ),
        compiler_params=pltpu.CompilerParams(
            dimension_semantics=("parallel", "parallel"),
            vmem_limit_bytes=vmem_limit,
        ),
    )(x3, pe3)


def positional_encoding(x: jnp.ndarray, pe: jnp.ndarray, *,
                        force_pallas: bool = False) -> jnp.ndarray:
    """x: (B, S, D); pe: (1, max_len, D). Returns x + pe[:, :S, :] in x.dtype."""
    B, S, D = x.shape
    if S > pe.shape[1]:
        raise ValueError(
            f"sequence length {S} exceeds positional-encoding max_len {pe.shape[1]}")

    itemsize = jnp.dtype(x.dtype).itemsize
    pe_s = pe[:, :S, :].astype(x.dtype)              # tiny table; cast once in the wrapper
    total_bytes = B * S * D * itemsize
    lane_dense = (S * D) % _LANES == 0

    # Escape hatch: tiny inputs or lane-misaligned d_model -> plain XLA add.
    # TODO(synk): for odd d_model, pad d_model to a multiple of 128 at the
    # model level (or fuse into the adjacent kernel) instead of masked stores.
    if not force_pallas and (total_bytes < _SMALL_INPUT_BYTES or not lane_dense):
        return x + pe_s

    target_bytes, vmem_limit = _generation_params()
    sublane = _sublane_multiple(itemsize)

    if lane_dense:
        # Lane-dense path: flatten (S, D) into rows of 128 lanes -> unmasked stores.
        R = (S * D) // _LANES
        x3 = x.reshape(B, R, _LANES)
        pe3 = pe_s.reshape(1, R, _LANES)
        rt = _row_tile(R, _LANES * itemsize, sublane, target_bytes)
        tb = _batch_tile(B, rt * _LANES * itemsize, target_bytes)
        out = _tiled_add(x3, pe3, rt, tb, vmem_limit)
        return out.reshape(B, S, D)

    # Forced-Pallas fallback for non-128-aligned S*D: seq tiled, D as lane dim
    # (masked stores; default routing sends these shapes to XLA above).
    rt = _row_tile(S, D * itemsize, sublane, target_bytes)
    tb = _batch_tile(B, rt * D * itemsize, target_bytes)
    return _tiled_add(x, pe_s, rt, tb, vmem_limit)


if __name__ == "__main__":
    MAX_LEN = 100
    key = jax.random.PRNGKey(0)

    # 1) Spec-sized demo shape (batch=2, seq=8, d_model=32) forced through the
    #    Pallas lane-dense path (S*D = 256 -> 2 rows of 128 lanes).
    B, S, D = 2, 8, 32
    x = jax.random.normal(key, (B, S, D), dtype=jnp.float32)
    pe = _build_pe(D, MAX_LEN)
    out = jax.block_until_ready(positional_encoding(x, pe, force_pallas=True))
    ref = x + pe[:, :S, :]
    assert out.shape == (B, S, D)
    assert jnp.allclose(out, ref, atol=1e-6), "lane-dense Pallas path mismatch"

    # 2) Same shape through default routing (tiny -> XLA escape hatch).
    out_xla = jax.block_until_ready(positional_encoding(x, pe))
    assert jnp.allclose(out_xla, ref, atol=1e-6), "XLA escape-hatch mismatch"

    # 3) Larger lane-dense shape that takes the Pallas path by default and
    #    exercises the batch-folded block.
    B2, S2, D2 = 16, 96, 256
    x2 = jax.random.normal(jax.random.PRNGKey(0), (B2, S2, D2), dtype=jnp.float32)
    pe2 = _build_pe(D2, MAX_LEN)
    out2 = jax.block_until_ready(positional_encoding(x2, pe2))
    ref2 = x2 + pe2[:, :S2, :]
    assert jnp.allclose(out2, ref2, atol=1e-6), "default Pallas path mismatch"

    # 4) Partial-block correctness: deliberately tiny tiles so both grid axes
    #    have a ragged last block (R=40 with row_tile=16, B=3 with batch_tile=2).
    B3, S3, D3 = 3, 40, 128
    x3 = jax.random.normal(jax.random.PRNGKey(0), (B3, S3, D3), dtype=jnp.float32)
    pe3_full = _build_pe(D3, MAX_LEN)
    pe3 = pe3_full[:, :S3, :]
    out3 = jax.block_until_ready(
        _tiled_add(x3, pe3, row_tile=16, batch_tile=2, vmem_limit=32 * 1024 * 1024))
    ref3 = x3 + pe3
    assert jnp.allclose(out3, ref3, atol=1e-6), "partial-block mismatch"

    # 5) Non-128-aligned d_model through the forced-Pallas masked-store fallback.
    B4, S4, D4 = 2, 8, 24
    x4 = jax.random.normal(jax.random.PRNGKey(0), (B4, S4, D4), dtype=jnp.float32)
    pe4 = _build_pe(D4, MAX_LEN)
    out4 = jax.block_until_ready(positional_encoding(x4, pe4, force_pallas=True))
    ref4 = x4 + pe4[:, :S4, :]
    assert jnp.allclose(out4, ref4, atol=1e-6), "non-aligned fallback mismatch"

    print("KERNEL_OK")
</pallas_src>

<mosaic_0001>
module attributes {stable_mosaic.version = 11 : i64} {
  func.func @_add_pe_kernel(%arg0: i32, %arg1: i32, %arg2: memref<2x2x128xf32, #tpu.memory_space<vmem>>, %arg3: memref<1x2x128xf32, #tpu.memory_space<vmem>>, %arg4: memref<2x2x128xf32, #tpu.memory_space<vmem>>) attributes {dimension_semantics = [#tpu.dimension_semantics<parallel>, #tpu.dimension_semantics<parallel>], iteration_bounds = array<i64: 1, 1>, scalar_prefetch = 0 : i64, scratch_operands = 0 : i64, tpu.core_type = #tpu.core_type<tc>, window_params = [{transform_indices = @transform_0, window_bounds = array<i64: 2, 2, 128>}, {transform_indices = @transform_1, window_bounds = array<i64: 1, 2, 128>}, {transform_indices = @transform_2, window_bounds = array<i64: 2, 2, 128>}]} {
    %c0 = arith.constant 0 : index
    %c0_0 = arith.constant 0 : index
    %c0_1 = arith.constant 0 : index
    %0 = vector.load %arg2[%c0, %c0_0, %c0_1] : memref<2x2x128xf32, #tpu.memory_space<vmem>>, vector<2x2x128xf32>
    %c0_2 = arith.constant 0 : index
    %c0_3 = arith.constant 0 : index
    %c0_4 = arith.constant 0 : index
    %1 = vector.load %arg3[%c0_2, %c0_3, %c0_4] : memref<1x2x128xf32, #tpu.memory_space<vmem>>, vector<1x2x128xf32>
    %2 = vector.broadcast %1 : vector<1x2x128xf32> to vector<2x2x128xf32>
    %3 = arith.addf %0, %2 : vector<2x2x128xf32>
    %c0_5 = arith.constant 0 : index
    %c0_6 = arith.constant 0 : index
    %c0_7 = arith.constant 0 : index
    %4 = vector.load %arg4[%c0_5, %c0_6, %c0_7] : memref<2x2x128xf32, #tpu.memory_space<vmem>>, vector<2x2x128xf32>
    tpu.vector_store %arg4[%c0_5, %c0_6, %c0_7], %3 {strides = array<i32>} : memref<2x2x128xf32, #tpu.memory_space<vmem>>, vector<2x2x128xf32>,
    return
  }
  func.func @transform_0(%arg0: i32, %arg1: i32) -> (i32, i32, i32) {
    %c0_i32 = arith.constant 0 : i32
    %c0_i32_0 = arith.constant 0 : i32
    return %arg1, %arg0, %c0_i32 : i32, i32, i32
  }
  func.func @transform_1(%arg0: i32, %arg1: i32) -> (i32, i32, i32) {
    %c0_i32 = arith.constant 0 : i32
    %c0_i32_0 = arith.constant 0 : i32
    %c0_i32_1 = arith.constant 0 : i32
    return %c0_i32, %arg0, %c0_i32_0 : i32, i32, i32
  }
  func.func @transform_2(%arg0: i32, %arg1: i32) -> (i32, i32, i32) {
    %c0_i32 = arith.constant 0 : i32
    %c0_i32_0 = arith.constant 0 : i32
    return %arg1, %arg0, %c0_i32 : i32, i32, i32
  }
}

</mosaic_0001>

<bundles_post_ra>
// kernel: tpu_custom_call.1
= control target key start
LH: loop header
LB: loop body
LE: loop exit
PB: predicated region body
PF: predicated region fallthrough
CT: control target
= control target key end

     0   :  { %7 = vsyncpa [#allocation3], 0  ;;  %s154_s0 = inlined_call_operand.hbm [shape: f32[2,2,128], index: 0, kind: input, shape index: {}]   ;;  %s155_s1 = inlined_call_operand.vmem [shape: f32[1,2,128], index: 1, kind: input, shape index: {}]   ;;  %s156_s2 = inlined_call_operand.hbm [shape: f32[2,2,128], index: 2, kind: output, shape index: {}]  }
   0x1   :  { %8 = vsyncpa [#allocation4], 0  ;;  %s102_s9 = smov [#allocation2]   ;;  %s54_s13 = scalar_lea.hbm %s154_s0, 64 }
   0x2   :  { %s14_s10 = sshll.u32 %s102_s9, 4  ;;  %p55_p0 = scmp.ne.s32.totalorder %s154_s0, %s54_s13  ;;  %s15_s10 = int_to_ptr.vmem [resolvable:$true] %s14_s10 }
   0x3   :  { %p58_p1 = scmp.lt.u32.totalorder %s54_s13, %s154_s0 }
   0x5   :  { %p60_p2 = pnand %p58_p1, %p55_p0 }
   0x7   :  { %63 = shalt.err (!%p60_p2)
}
   0x8   :  { %s64_s18 = scalar_lea.vmem %s15_s10, 64  ;;  %p69_p4 = scmp.lt.s32.totalorder %s15_s10, %s15_s10 }
   0x9   :  { %p65_p3 = scmp.ne.s32.totalorder %s15_s10, %s64_s18  ;;  %p70_p5 = scmp.lt.s32.totalorder %s64_s18, %s64_s18 }
   0xb   :  { %p71_p6 = por %p70_p5, %p69_p4 }
   0xd   :  { %p72_p7 = pnand %p71_p6, %p65_p3 }
   0xf   :  { %75 = shalt.err (!%p72_p7)
}
  0x10   :  { %s103_s19 = smov 32   ;;  %s104_s20 = smov 2  }
  0x11   :  { %20 = dma.hbm_to_vmem [thread:$0]  %s154_s0, 64, %s15_s10, [#allocation3], %s103_s19, %s103_s19, %s104_s20  }
  0x12   :  { %98 = dma.done.wait [#allocation3], 64  }
  0x13   :  { %99 = vsyncadd [#allocation3], 4294967232  ;;  %s105_s23 = smov [#allocation5]   ;;  %v26_v0 = vld [vmem:[#allocation2] sm:$0x3] }
  0x14   :  { %s38_s24 = sshll.u32 %s105_s23, 4  ;;  %v28_v1 = vld [vmem:[%s155_s1] sm:$0x3]  ;;  %v27_v2 = vld [vmem:[#allocation2 + $0x2] sm:$0x3]  ;;  %s39_s24 = int_to_ptr.vmem [resolvable:$true] %s38_s24 }
  0x15   :  { %v29_v3 = vadd.f32 %v28_v1, %v26_v0  ;;  %v30_v4 = vadd.f32 %v28_v1, %v27_v2  ;;  %s76_s27 = scalar_lea.vmem %s39_s24, 64  ;;  %p81_p9 = scmp.lt.s32.totalorder %s39_s24, %s39_s24 }
  0x16   :  { %p77_p8 = scmp.ne.s32.totalorder %s39_s24, %s76_s27  ;;  %p82_p10 = scmp.lt.s32.totalorder %s76_s27, %s76_s27 }
  0x17   :  { %31 = vst [vmem:[#allocation5] sm:$0x3] %v29_v3  ;;  %32 = vst [vmem:[#allocation5 + $0x2] sm:$0x3] %v30_v4 }
  0x18   :  { %p83_p11 = por %p82_p10, %p81_p9 }
  0x1a   :  { %p84_p12 = pnand %p83_p11, %p77_p8 }
  0x1c   :  { %87 = shalt.err (!%p84_p12)
}
  0x1d   :  { %s88_s29 = scalar_lea.hbm %s156_s2, 64 }
  0x1e   :  { %p89_p13 = scmp.ne.s32.totalorder %s156_s2, %s88_s29  ;;  %p92_p0 = scmp.lt.u32.totalorder %s88_s29, %s156_s2 }
  0x20   :  { %p94_p1 = pnand %p92_p0, %p89_p13 }
  0x22   :  { %97 = shalt.err (!%p94_p1)
}
  0x23   :  { %44 = dma.vmem_to_hbm [thread:$0]  %s39_s24, 64, %s156_s2, [#allocation4], %s103_s19, %s103_s19, %s104_s20  }
  0x24   :  { %100 = dma.done.wait [#allocation4], 64  }
  0x25   :  { %101 = vsyncadd [#allocation4], 4294967232 }
  0x26   :  { %48 = vsyncpa [#allocation3], 1 }
  0x27   :  { %49 = vsyncpa [#allocation4], 1 }

</bundles_post_ra>
